<compile_context>
chip_gen: v6e
topology: v6e:2x2x1
jax: 0.10.0
libtpu: 0.0.40
codegen_flags: <defaults>
</compile_context>

<pallas_src>
import math
import functools

import jax
import jax.numpy as jnp
from jax.experimental import pallas as pl
from jax.experimental.pallas import tpu as pltpu


_GELU_C = math.sqrt(2.0 / math.pi)


def _gelu_tanh(x):
    # matches the reference gelu(): 0.5*x*(1+tanh(sqrt(2/pi)*(x+0.044715*x^3)))
    return 0.5 * x * (1.0 + jnp.tanh(_GELU_C * (x + 0.044715 * x * x * x)))


# ----------------------------- kernels --------------------------------------


def _mlp_kernel_fullk(x_ref, wfc_ref, bfc_ref, wproj_ref, bproj_ref, o_ref):
    # Whole n_state resident in VMEM: 1-D grid over M tiles, no accumulator.
    # x_ref: (tm, nx); wfc_ref: (nx, n_state); bfc_ref: (1, n_state) f32
    # wproj_ref: (n_state, nx); bproj_ref: (1, nx) f32; o_ref: (tm, nx)
    h = jnp.dot(x_ref[...], wfc_ref[...], preferred_element_type=jnp.float32)
    h = _gelu_tanh(h + bfc_ref[...])                 # f32 bias-add + f32 gelu
    out = jnp.dot(h.astype(wproj_ref.dtype), wproj_ref[...],
                  preferred_element_type=jnp.float32)
    o_ref[...] = (out + bproj_ref[...]).astype(o_ref.dtype)


def _mlp_kernel_ksplit(x_ref, wfc_ref, bfc_ref, wproj_ref, bproj_ref, o_ref,
                       acc_ref):
    # K-sliced variant (only used when full-K residency does not fit VMEM).
    # x_ref: (tm, nx); wfc_ref: (nx, tk); bfc_ref: (1, tk) f32
    # wproj_ref: (tk, nx); bproj_ref: (1, nx) f32; acc_ref: (tm, nx) f32
    k = pl.program_id(1)

    @pl.when(k == 0)
    def _init():
        acc_ref[...] = jnp.zeros_like(acc_ref)

    h = jnp.dot(x_ref[...], wfc_ref[...], preferred_element_type=jnp.float32)
    h = _gelu_tanh(h + bfc_ref[...])
    acc_ref[...] += jnp.dot(h.astype(wproj_ref.dtype), wproj_ref[...],
                            preferred_element_type=jnp.float32)

    @pl.when(k == pl.num_programs(1) - 1)
    def _finish():
        o_ref[...] = (acc_ref[...] + bproj_ref[...]).astype(o_ref.dtype)


# ------------------------- tile / budget selection ---------------------------


def _round_up(x, m):
    return -(-x // m) * m


def _row_granule(dtype):
    """Sublane packing granule for the row-tile dimension."""
    isz = jnp.dtype(dtype).itemsize
    if isz >= 4:
        return 8
    if isz == 2:
        return 16
    return 32   # fp8 / int8


def _tpu_vmem_info():
    phys = 128 * 1024 * 1024
    try:
        info = pltpu.get_tpu_info()
        phys = int(getattr(info, "vmem_capacity_bytes", phys))
    except Exception:
        pass
    # v7x is the only generation with <=64 MiB VMEM per TensorCore (and 2 TCs).
    two_tc = phys <= 64 * 1024 * 1024
    budget = int(phys * 0.60)        # tile-selection budget (headroom for Mosaic)
    vmem_limit = int(phys * 0.75)    # compiler scoped-VMEM limit
    return budget, vmem_limit, two_tc


def _fp_fullk(tm, nx, n_state, x_b, w_b, o_b):
    return (2 * tm * nx * x_b            # x tile, double buffered
            + 2 * tm * nx * o_b          # out tile, double buffered
            + 2 * nx * n_state * w_b     # W_fc + W_proj, single buffered
            + (n_state + nx) * 4         # biases (f32)
            + tm * n_state * (4 + w_b))  # f32 hidden + its cast for matmul 2


def _fp_ksplit(tm, tk, nx, n_state, x_b, w_b, o_b, n_wbuf):
    return (2 * tm * nx * x_b
            + 2 * tm * nx * o_b
            + n_wbuf * 2 * nx * tk * w_b   # W_fc / W_proj K-slices
            + n_wbuf * tk * 4 + nx * 4     # bias slices (f32)
            + tm * nx * 4                  # f32 accumulator scratch
            + tm * tk * (4 + w_b))         # f32 hidden slice + cast


def _legal_tm(t, M, granule):
    if t >= M:
        return M                 # full-extent block is always legal
    return max(granule, (t // granule) * granule)


def _select_tiles(M, nx, n_state, x_b, w_b, o_b, budget, two_tc, granule,
                  tm_user, tk_user):
    """Returns (tm, tk, k_steps, n_weight_buffers)."""
    # --- explicit user tiles (tests / sweeps) ---
    if tm_user is not None or tk_user is not None:
        if tm_user is not None:
            tm = _legal_tm(int(tm_user), M, granule)
        else:
            tm = _legal_tm(min(M, 512), M, granule)
        if tk_user is None:
            tk = n_state
        else:
            tk = int(tk_user)
            if tk >= n_state or n_state % tk != 0 or tk % 128 != 0:
                tk = n_state     # keep the K accumulation exact
        return tm, tk, n_state // tk, 2

    tm_cap = 512 if two_tc else 1024
    tm = _legal_tm(min(M, tm_cap), M, granule)
    # v7x has 2 TensorCores: keep >=2 steps on the parallel M axis when possible.
    if two_tc and tm >= M and M > granule:
        tm = _legal_tm(_round_up(-(-M // 2), granule), M, granule)

    def tm_list(floor):
        cands, t = [], tm
        while True:
            cands.append(t)
            nt = _legal_tm(max(floor, t // 2), M, granule)
            if nt >= t:
                break
            t = nt
        return cands

    # 1) Preferred: single K step, both weight matrices fully VMEM-resident.
    for t in tm_list(_legal_tm(min(M, 256), M, granule)):
        if _fp_fullk(t, nx, n_state, x_b, w_b, o_b) <= budget:
            return t, n_state, 1, 1

    # 2) Forced: split n_state into MXU-friendly K slices (multiples of 256;
    #    128 only as a last resort; 384 deliberately excluded).
    tk_cands = [c for c in (2048, 1024, 512, 256, 128)
                if c < n_state and n_state % c == 0]
    if not tk_cands:
        tk_cands = [n_state]
    for tk in tk_cands:
        for t in tm_list(granule):
            if _fp_ksplit(t, tk, nx, n_state, x_b, w_b, o_b, 2) <= budget:
                ks = n_state // tk
                n_wbuf = 3 if (ks >= 3 and _fp_ksplit(
                    t, tk, nx, n_state, x_b, w_b, o_b, 3) <= budget) else 2
                return t, tk, ks, n_wbuf

    # 3) Last resort: smallest tiles; rely on the vmem limit.
    tk = tk_cands[-1]
    return _legal_tm(granule, M, granule), tk, n_state // tk, 2


# ------------------------------ wrapper --------------------------------------


@functools.partial(jax.jit, static_argnames=("tm", "tk", "compute_dtype"))
def mlp_forward(x, w_fc, b_fc, w_proj, b_proj, *, tm=None, tk=None,
                compute_dtype=jnp.bfloat16):
    """x: (..., n_embd) -> (..., n_embd), GPT-2 MLP forward.

    compute_dtype controls the MXU input dtype (default bf16; accumulation,
    bias-add and gelu stay f32).  Pass jnp.float32 for an exact f32 path.
    """
    orig_shape = x.shape
    out_dtype = x.dtype
    nx = orig_shape[-1]
    n_state = w_fc.shape[1]

    x2d = x.reshape(-1, nx)
    M = x2d.shape[0]

    if compute_dtype is not None:
        x2d = x2d.astype(compute_dtype)
        w_fc = w_fc.astype(compute_dtype)
        w_proj = w_proj.astype(compute_dtype)
    # Biases stay f32: added to the f32 MXU accumulators.
    b_fc2 = b_fc.reshape(1, n_state).astype(jnp.float32)
    b_proj2 = b_proj.reshape(1, nx).astype(jnp.float32)

    x_b = x2d.dtype.itemsize
    w_b = w_fc.dtype.itemsize
    o_b = jnp.dtype(out_dtype).itemsize

    budget, vmem_limit, two_tc = _tpu_vmem_info()
    granule = _row_granule(x2d.dtype)
    tm_, tk_, k_steps, n_wbuf = _select_tiles(
        M, nx, n_state, x_b, w_b, o_b, budget, two_tc, granule, tm, tk)
    m_steps = pl.cdiv(M, tm_)

    single = pl.Buffered(1)

    # Advisory cost estimate with the *real* traffic: weights are re-fetched
    # once per M-tile only when the K axis is split.
    if k_steps == 1:
        weight_bytes = 2 * nx * n_state * w_b + (n_state + nx) * 4
    else:
        weight_bytes = m_steps * (2 * nx * n_state * w_b + n_state * 4) + nx * 4
    cost = pl.CostEstimate(
        flops=4 * M * nx * n_state,          # two matmuls
        transcendentals=M * n_state,         # one tanh per hidden element
        bytes_accessed=int(M * nx * x_b + M * nx * o_b + weight_bytes))

    if k_steps == 1:
        grid = (m_steps,)
        in_specs = [
            pl.BlockSpec((tm_, nx), lambda i: (i, 0)),
            pl.BlockSpec((nx, n_state), lambda i: (0, 0), pipeline_mode=single),
            pl.BlockSpec((1, n_state), lambda i: (0, 0), pipeline_mode=single),
            pl.BlockSpec((n_state, nx), lambda i: (0, 0), pipeline_mode=single),
            pl.BlockSpec((1, nx), lambda i: (0, 0), pipeline_mode=single),
        ]
        out_specs = pl.BlockSpec((tm_, nx), lambda i: (i, 0))
        kernel = _mlp_kernel_fullk
        scratch = []
        dim_sem = ("parallel",)
    else:
        grid = (m_steps, k_steps)
        w_mode = pl.Buffered(n_wbuf) if n_wbuf != 2 else None

        def _wspec(shape, index_map):
            if w_mode is None:
                return pl.BlockSpec(shape, index_map)
            return pl.BlockSpec(shape, index_map, pipeline_mode=w_mode)

        in_specs = [
            pl.BlockSpec((tm_, nx), lambda i, k: (i, 0)),      # x tile (reused over k)
            _wspec((nx, tk_), lambda i, k: (0, k)),            # W_fc K-slice
            _wspec((1, tk_), lambda i, k: (0, k)),             # b_fc K-slice
            _wspec((tk_, nx), lambda i, k: (k, 0)),            # W_proj K-slice
            pl.BlockSpec((1, nx), lambda i, k: (0, 0), pipeline_mode=single),
        ]
        out_specs = pl.BlockSpec((tm_, nx), lambda i, k: (i, 0))
        kernel = _mlp_kernel_ksplit
        scratch = [pltpu.VMEM((tm_, nx), jnp.float32)]
        dim_sem = ("parallel", "arbitrary")

    out2d = pl.pallas_call(
        kernel,
        out_shape=jax.ShapeDtypeStruct((M, nx), out_dtype),
        grid_spec=pltpu.PrefetchScalarGridSpec(
            num_scalar_prefetch=0,
            grid=grid,
            in_specs=in_specs,
            out_specs=out_specs,
            scratch_shapes=scratch,
        ),
        compiler_params=pltpu.CompilerParams(
            dimension_semantics=dim_sem,
            vmem_limit_bytes=vmem_limit,
        ),
        cost_estimate=cost,
    )(x2d, w_fc, b_fc2, w_proj, b_proj2)

    return out2d.reshape(orig_shape)


# ------------------------------ reference / test -----------------------------


def init_mlp_params(key, n_state, n_embd, dtype=jnp.float32):
    """Deterministic init matching Conv1D.__init__: normal(std=0.02) w, zero b."""
    k1, k2 = jax.random.split(key)
    w_fc = (0.02 * jax.random.normal(k1, (n_embd, n_state))).astype(dtype)
    b_fc = jnp.zeros((n_state,), dtype)
    w_proj = (0.02 * jax.random.normal(k2, (n_state, n_embd))).astype(dtype)
    b_proj = jnp.zeros((n_embd,), dtype)
    return w_fc, b_fc, w_proj, b_proj


def _mlp_ref(x, w_fc, b_fc, w_proj, b_proj):
    h = _gelu_tanh(x @ w_fc + b_fc)
    return h @ w_proj + b_proj


if __name__ == "__main__":
    key = jax.random.PRNGKey(0)
    kx, kp = jax.random.split(key)

    batch, seq, n_embd = 2, 16, 64
    n_state = 4 * n_embd  # 256, GPT-2 convention

    x = jax.random.normal(kx, (batch, seq, n_embd), dtype=jnp.float32)
    w_fc, b_fc, w_proj, b_proj = init_mlp_params(kp, n_state, n_embd)

    ref = _mlp_ref(x, w_fc, b_fc, w_proj, b_proj)

    # 1) auto tiling, f32 end-to-end (exact vs reference); single-K fast path
    out = jax.block_until_ready(
        mlp_forward(x, w_fc, b_fc, w_proj, b_proj, compute_dtype=jnp.float32))
    assert out.shape == x.shape
    assert jnp.allclose(out, ref, atol=1e-5, rtol=1e-5), "auto-tile mismatch"

    # 2) explicit small tiles -> multi-step grid (exercises the forced K-split
    #    accumulation path and the M-axis pipelining)
    out_tiled = jax.block_until_ready(
        mlp_forward(x, w_fc, b_fc, w_proj, b_proj, tm=16, tk=128,
                    compute_dtype=jnp.float32))
    assert jnp.allclose(out_tiled, ref, atol=1e-5, rtol=1e-5), "tiled mismatch"

    # 3) default bf16 MXU path (f32 accumulation); looser tolerance vs f32 ref
    out_bf16 = jax.block_until_ready(mlp_forward(x, w_fc, b_fc, w_proj, b_proj))
    assert jnp.allclose(out_bf16, ref, atol=5e-2, rtol=5e-2), "bf16 mismatch"

    # TODO(synk): optional fp8 weight quantization for v7x left unimplemented.
    print("KERNEL_OK")
</pallas_src>

<mosaic_0001>
module attributes {stable_mosaic.version = 11 : i64} {
  func.func @_mlp_kernel_fullk(%arg0: i32, %arg1: memref<32x64xf32, #tpu.memory_space<vmem>>, %arg2: memref<64x256xf32, #tpu.memory_space<vmem>>, %arg3: memref<1x256xf32, #tpu.memory_space<vmem>>, %arg4: memref<256x64xf32, #tpu.memory_space<vmem>>, %arg5: memref<1x64xf32, #tpu.memory_space<vmem>>, %arg6: memref<32x64xf32, #tpu.memory_space<vmem>>) attributes {dimension_semantics = [#tpu.dimension_semantics<parallel>], iteration_bounds = array<i64: 1>, scalar_prefetch = 0 : i64, scratch_operands = 0 : i64, tpu.core_type = #tpu.core_type<tc>, window_params = [{transform_indices = @transform_0, window_bounds = array<i64: 32, 64>}, {pipeline_mode = #tpu.pipeline_mode<synchronous>, transform_indices = @transform_1, window_bounds = array<i64: 64, 256>}, {pipeline_mode = #tpu.pipeline_mode<synchronous>, transform_indices = @transform_2, window_bounds = array<i64: 1, 256>}, {pipeline_mode = #tpu.pipeline_mode<synchronous>, transform_indices = @transform_3, window_bounds = array<i64: 256, 64>}, {pipeline_mode = #tpu.pipeline_mode<synchronous>, transform_indices = @transform_4, window_bounds = array<i64: 1, 64>}, {transform_indices = @transform_5, window_bounds = array<i64: 32, 64>}]} {
    %c0 = arith.constant 0 : index
    %c0_0 = arith.constant 0 : index
    %0 = vector.load %arg1[%c0, %c0_0] : memref<32x64xf32, #tpu.memory_space<vmem>>, vector<32x64xf32>
    %c0_1 = arith.constant 0 : index
    %c0_2 = arith.constant 0 : index
    %1 = vector.load %arg2[%c0_1, %c0_2] : memref<64x256xf32, #tpu.memory_space<vmem>>, vector<64x256xf32>
    %cst = arith.constant dense<0.000000e+00> : vector<32x256xf32>
    %2 = tpu.matmul %0, %1, %cst {dimension_numbers = #tpu.dot_dimension_numbers<[1], [0], [0], [1], [0, 0, 1, 1], [], []>} : vector<32x64xf32>, vector<64x256xf32>, vector<32x256xf32> -> vector<32x256xf32>
    %c0_3 = arith.constant 0 : index
    %c0_4 = arith.constant 0 : index
    %3 = vector.load %arg3[%c0_3, %c0_4] : memref<1x256xf32, #tpu.memory_space<vmem>>, vector<1x256xf32>
    %4 = vector.broadcast %3 : vector<1x256xf32> to vector<32x256xf32>
    %5 = arith.addf %2, %4 : vector<32x256xf32>
    %cst_5 = arith.constant 5.000000e-01 : f32
    %6 = vector.broadcast %cst_5 : f32 to vector<32x256xf32>
    %7 = arith.mulf %6, %5 : vector<32x256xf32>
    %cst_6 = arith.constant 4.471500e-02 : f32
    %8 = vector.broadcast %cst_6 : f32 to vector<32x256xf32>
    %9 = arith.mulf %8, %5 : vector<32x256xf32>
    %10 = arith.mulf %9, %5 : vector<32x256xf32>
    %11 = arith.mulf %10, %5 : vector<32x256xf32>
    %12 = arith.addf %5, %11 : vector<32x256xf32>
    %cst_7 = arith.constant 0.797884583 : f32
    %13 = vector.broadcast %cst_7 : f32 to vector<32x256xf32>
    %14 = arith.mulf %13, %12 : vector<32x256xf32>
    %15 = math.tanh %14 : vector<32x256xf32>
    %cst_8 = arith.constant 1.000000e+00 : f32
    %16 = vector.broadcast %cst_8 : f32 to vector<32x256xf32>
    %17 = arith.addf %16, %15 : vector<32x256xf32>
    %18 = arith.mulf %7, %17 : vector<32x256xf32>
    %c0_9 = arith.constant 0 : index
    %c0_10 = arith.constant 0 : index
    %19 = vector.load %arg4[%c0_9, %c0_10] : memref<256x64xf32, #tpu.memory_space<vmem>>, vector<256x64xf32>
    %cst_11 = arith.constant dense<0.000000e+00> : vector<32x64xf32>
    %20 = tpu.matmul %18, %19, %cst_11 {dimension_numbers = #tpu.dot_dimension_numbers<[1], [0], [0], [1], [0, 0, 1, 1], [], []>} : vector<32x256xf32>, vector<256x64xf32>, vector<32x64xf32> -> vector<32x64xf32>
    %c0_12 = arith.constant 0 : index
    %c0_13 = arith.constant 0 : index
    %21 = vector.load %arg5[%c0_12, %c0_13] : memref<1x64xf32, #tpu.memory_space<vmem>>, vector<1x64xf32>
    %22 = vector.broadcast %21 : vector<1x64xf32> to vector<32x64xf32>
    %23 = arith.addf %20, %22 : vector<32x64xf32>
    %c0_14 = arith.constant 0 : index
    %c0_15 = arith.constant 0 : index
    %24 = vector.load %arg6[%c0_14, %c0_15] : memref<32x64xf32, #tpu.memory_space<vmem>>, vector<32x64xf32>
    tpu.vector_store %arg6[%c0_14, %c0_15], %23 {strides = array<i32>} : memref<32x64xf32, #tpu.memory_space<vmem>>, vector<32x64xf32>,
    return
  }
  func.func @transform_0(%arg0: i32) -> (i32, i32) {
    %c0_i32 = arith.constant 0 : i32
    %c0_i32_0 = arith.constant 0 : i32
    return %arg0, %c0_i32 : i32, i32
  }
  func.func @transform_1(%arg0: i32) -> (i32, i32) {
    %c0_i32 = arith.constant 0 : i32
    %c0_i32_0 = arith.constant 0 : i32
    %c0_i32_1 = arith.constant 0 : i32
    return %c0_i32, %c0_i32_0 : i32, i32
  }
  func.func @transform_2(%arg0: i32) -> (i32, i32) {
    %c0_i32 = arith.constant 0 : i32
    %c0_i32_0 = arith.constant 0 : i32
    %c0_i32_1 = arith.constant 0 : i32
    return %c0_i32, %c0_i32_0 : i32, i32
  }
  func.func @transform_3(%arg0: i32) -> (i32, i32) {
    %c0_i32 = arith.constant 0 : i32
    %c0_i32_0 = arith.constant 0 : i32
    %c0_i32_1 = arith.constant 0 : i32
    return %c0_i32, %c0_i32_0 : i32, i32
  }
  func.func @transform_4(%arg0: i32) -> (i32, i32) {
    %c0_i32 = arith.constant 0 : i32
    %c0_i32_0 = arith.constant 0 : i32
    %c0_i32_1 = arith.constant 0 : i32
    return %c0_i32, %c0_i32_0 : i32, i32
  }
  func.func @transform_5(%arg0: i32) -> (i32, i32) {
    %c0_i32 = arith.constant 0 : i32
    %c0_i32_0 = arith.constant 0 : i32
    return %arg0, %c0_i32 : i32, i32
  }
}

</mosaic_0001>

<bundles_post_ra>
// kernel: mlp_forward.1
= control target key start
LH: loop header
LB: loop body
LE: loop exit
PB: predicated region body
PF: predicated region fallthrough
CT: control target
= control target key end

     0   :  { %v462_v4 = vmov 0.0   ;;  %s704_s0 = inlined_call_operand.vmem [shape: f32[32,64], index: 0, kind: input, shape index: {}]   ;;  %s705_s1 = inlined_call_operand.vmem [shape: f32[64,256], index: 1, kind: input, shape index: {}]   ;;  %s706_s2 = inlined_call_operand.vmem [shape: f32[1,256], index: 2, kind: input, shape index: {}]   ;;  %s707_s3 = inlined_call_operand.vmem [shape: f32[256,64], index: 3, kind: input, shape index: {}]   ;;  %s708_s4 = inlined_call_operand.vmem [shape: f32[1,64], index: 4, kind: input, shape index: {}]   ;;  %s709_s5 = inlined_call_operand.hbm [shape: f32[32,64], index: 5, kind: output, shape index: {}]  }
   0x1   :  { %v40_v0 = vld [vmem:[%s705_s1 + $0x78] sm:$0xff]  ;;  %v39_v1 = vld [vmem:[%s705_s1 + $0x70] sm:$0xff]  ;;  %v38_v2 = vld [vmem:[%s705_s1 + $0x68] sm:$0xff]  ;;  %130 = vmatprep.mubr.f32.mxu0 %v462_v4 }
   0x2   :  { %82 = vmatprep.subr.mxu0 %v40_v0  ;;  %v37_v3 = vld [vmem:[%s705_s1 + $0x60] sm:$0xff]  ;;  %v36_v5 = vld [vmem:[%s705_s1 + $0x58] sm:$0xff]  ;;  %v35_v6 = vld [vmem:[%s705_s1 + $0x50] sm:$0xff] }
   0x3   :  { %83 = vmatpush1.msra.mxu0 %v39_v1  ;;  %v34_v7 = vld [vmem:[%s705_s1 + $0x48] sm:$0xff]  ;;  %v33_v8 = vld [vmem:[%s705_s1 + $0x40] sm:$0xff]  ;;  %v32_v9 = vld [vmem:[%s705_s1 + $0x38] sm:$0xff] }
   0x4   :  { %84 = vmatprep.subr.mxu0 %v38_v2  ;;  %v31_v10 = vld [vmem:[%s705_s1 + $0x30] sm:$0xff] }
   0x5   :  { %85 = vmatpush1.msra.mxu0 %v37_v3 }
   0x6   :  { %86 = vmatprep.subr.mxu0 %v36_v5 }
   0x7   :  { %87 = vmatpush1.msra.mxu0 %v35_v6 }
   0x8   :  { %88 = vmatprep.subr.mxu0 %v34_v7 }
   0x9   :  { %10 = vsyncpa [#allocation3], 0  ;;  %89 = vmatpush1.msra.mxu0 %v33_v8  ;;  %v30_v11 = vld [vmem:[%s705_s1 + $0x28] sm:$0xff]  ;;  %v29_v12 = vld [vmem:[%s705_s1 + $0x20] sm:$0xff]  ;;  %vm53_vm0 = vcmask 523264   ;;  %v43_v53 = vlaneseq  ;;  %s463_s18 = smov [#allocation2]  }
   0xa   :  { %90 = vmatprep.subr.mxu0 %v32_v9  ;;  %v28_v13 = vld [vmem:[%s705_s1 + $0x18] sm:$0xff]  ;;  %v27_v14 = vld [vmem:[%s705_s1 + $0x10] sm:$0xff]  ;;  %v26_v15 = vld [vmem:[%s705_s1 + $0x8] sm:$0xff]  ;;  %s360_s19 = sshll.u32 %s463_s18, 4  ;;  %s361_s19 = int_to_ptr.vmem [resolvable:$true] %s360_s19 }
   0xb   :  { %91 = vmatpush1.msra.mxu0 %v31_v10  ;;  %v25_v16 = vld [vmem:[%s705_s1] sm:$0xff]  ;;  %v22_v18 = vld [vmem:[%s704_s0 + $0x8] sm:$0xff]  ;;  %v23_v19 = vld [vmem:[%s704_s0 + $0x10] sm:$0xff]  ;;  %v44_v54 = vshrl.u32 %v43_v53, 7  ;;  %p445_p1 = scmp.lt.s32.totalorder %s361_s19, %s361_s19 }
   0xc   :  { %92 = vmatprep.subr.mxu0 %v30_v11  ;;  %v21_v17 = vld [vmem:[%s704_s0] sm:$0xff]  ;;  %v24_v20 = vld [vmem:[%s704_s0 + $0x18] sm:$0xff]  ;;  %v257_v23 = vld [vmem:[%s707_s3 + $0xf0] sm:$0xff] }
   0xd   :  { %93 = vmatpush1.msra.mxu0 %v29_v12  ;;  %v258_v21 = vld [vmem:[%s707_s3 + $0xf8] sm:$0xff]  ;;  %v241_v24 = vld [vmem:[%s707_s3 + $0x70] sm:$0xff]  ;;  %v256_v25 = vld [vmem:[%s707_s3 + $0xe8] sm:$0xff]  ;;  %v45_v55 = vsub.s32 0, %v44_v54  ;;  %v49_v57 = vsub.s32 1, %v44_v54 }
   0xe   :  { %94 = vmatprep.subr.mxu0 %v28_v13  ;;  %376 = vmatprep.subr.mxu1 %v258_v21  ;;  %v242_v22 = vld [vmem:[%s707_s3 + $0x78] sm:$0xff]  ;;  %v240_v26 = vld [vmem:[%s707_s3 + $0x68] sm:$0xff]  ;;  %v255_v27 = vld [vmem:[%s707_s3 + $0xe0] sm:$0xff] }
   0xf   :  { %95 = vmatpush1.msra.mxu0 %v27_v14  ;;  %377 = vmatpush3.msra.mxu1 %v242_v22  ;;  %v239_v28 = vld [vmem:[%s707_s3 + $0x60] sm:$0xff]  ;;  %v254_v29 = vld [vmem:[%s707_s3 + $0xd8] sm:$0xff]  ;;  %v253_v31 = vld [vmem:[%s707_s3 + $0xd0] sm:$0xff] }
  0x10   :  { %96 = vmatprep.subr.mxu0 %v26_v15  ;;  %378 = vmatprep.subr.mxu1 %v257_v23  ;;  %v238_v30 = vld [vmem:[%s707_s3 + $0x58] sm:$0xff]  ;;  %v237_v32 = vld [vmem:[%s707_s3 + $0x50] sm:$0xff]  ;;  %v252_v33 = vld [vmem:[%s707_s3 + $0xc8] sm:$0xff] }
  0x11   :  { %97 = vmatpush1.msra.mxu0 %v25_v16  ;;  %379 = vmatpush3.msra.mxu1 %v241_v24  ;;  %v236_v34 = vld [vmem:[%s707_s3 + $0x48] sm:$0xff]  ;;  %v251_v35 = vld [vmem:[%s707_s3 + $0xc0] sm:$0xff]  ;;  %v250_v37 = vld [vmem:[%s707_s3 + $0xb8] sm:$0xff] }
  0x12   :  { %371 = vmatmul.mubr.msk.f32.vlgmr.msra.gmra.mxu0 %vm53_vm0, %v21_v17  ;;  %380 = vmatprep.subr.mxu1 %v256_v25  ;;  %v235_v36 = vld [vmem:[%s707_s3 + $0x40] sm:$0xff]  ;;  %v234_v38 = vld [vmem:[%s707_s3 + $0x38] sm:$0xff]  ;;  %v249_v39 = vld [vmem:[%s707_s3 + $0xb0] sm:$0xff] }
  0x13   :  { %136 = vmatprep.mubr.f32.mxu0 %v462_v4  ;;  %381 = vmatpush3.msra.mxu1 %v240_v26  ;;  %v233_v40 = vld [vmem:[%s707_s3 + $0x30] sm:$0xff]  ;;  %v248_v41 = vld [vmem:[%s707_s3 + $0xa8] sm:$0xff]  ;;  %v247_v43 = vld [vmem:[%s707_s3 + $0xa0] sm:$0xff] }
  0x14   :  { %382 = vmatprep.subr.mxu1 %v255_v27  ;;  %v232_v42 = vld [vmem:[%s707_s3 + $0x28] sm:$0xff]  ;;  %v231_v44 = vld [vmem:[%s707_s3 + $0x20] sm:$0xff]  ;;  %v246_v45 = vld [vmem:[%s707_s3 + $0x98] sm:$0xff] }
  0x15   :  { %383 = vmatpush3.msra.mxu1 %v239_v28  ;;  %v230_v46 = vld [vmem:[%s707_s3 + $0x18] sm:$0xff]  ;;  %v245_v47 = vld [vmem:[%s707_s3 + $0x90] sm:$0xff]  ;;  %v244_v49 = vld [vmem:[%s707_s3 + $0x88] sm:$0xff] }
  0x16   :  { %372 = vmatmul.mubr.msk.f32.gmra.mxu0 %vm53_vm0, %v22_v18  ;;  %384 = vmatprep.subr.mxu1 %v254_v29  ;;  %v229_v48 = vld [vmem:[%s707_s3 + $0x10] sm:$0xff]  ;;  %v228_v50 = vld [vmem:[%s707_s3 + $0x8] sm:$0xff]  ;;  %v243_v51 = vld [vmem:[%s707_s3 + $0x80] sm:$0xff] }
  0x17   :  { %142 = vmatprep.mubr.f32.mxu0 %v462_v4  ;;  %385 = vmatpush3.msra.mxu1 %v238_v30  ;;  %v227_v52 = vld [vmem:[%s707_s3] sm:$0xff] }
  0x18   :  { %386 = vmatprep.subr.mxu1 %v253_v31  ;;  %v41_v56 = vld [vmem:[%s706_s2] sm:$0x3] }
  0x19   :  { %387 = vmatpush3.msra.mxu1 %v237_v32  ;;  %v46_v58 = vrot.slane %v41_v56, %v45_v55  ;;  %v50_v59 = vrot.slane %v41_v56, %v49_v57 }
  0x1a   :  { %373 = vmatmul.mubr.msk.f32.gmra.mxu0 %vm53_vm0, %v23_v19  ;;  %388 = vmatprep.subr.mxu1 %v252_v33 }
  0x1b   :  { %148 = vmatprep.mubr.f32.mxu0 %v462_v4  ;;  %389 = vmatpush3.msra.mxu1 %v236_v34 }
  0x1c   :  { %390 = vmatprep.subr.mxu1 %v251_v35 }
  0x1d   :  { %391 = vmatpush3.msra.mxu1 %v235_v36 }
  0x1e   :  { %374 = vmatmul.mubr.msk.f32.gmra.mxu0 %vm53_vm0, %v24_v20  ;;  %392 = vmatprep.subr.mxu1 %v250_v37 }
  0x1f   :  { %393 = vmatpush3.msra.mxu1 %v234_v38 }
  0x20   :  { %394 = vmatprep.subr.mxu1 %v249_v39 }
  0x21   :  { %395 = vmatpush3.msra.mxu1 %v233_v40 }
  0x22   :  { %396 = vmatprep.subr.mxu1 %v248_v41 }
  0x23   :  { %397 = vmatpush3.msra.mxu1 %v232_v42 }
  0x24   :  { %398 = vmatprep.subr.mxu1 %v247_v43 }
  0x25   :  { %399 = vmatpush3.msra.mxu1 %v231_v44 }
  0x26   :  { %400 = vmatprep.subr.mxu1 %v246_v45 }
  0x27   :  { %401 = vmatpush3.msra.mxu1 %v230_v46 }
  0x28   :  { %402 = vmatprep.subr.mxu1 %v245_v47 }
  0x29   :  { %403 = vmatpush3.msra.mxu1 %v229_v48 }
  0x2a   :  { %404 = vmatprep.subr.mxu1 %v244_v49 }
  0x2b   :  { %405 = vmatpush3.msra.mxu1 %v228_v50 }
  0x2c   :  { %406 = vmatprep.subr.mxu1 %v243_v51 }
  0x2d   :  { %407 = vmatpush3.msra.mxu1 %v227_v52 }
  0xd2   :  { %v132_v60 = vpop.f32.mrf.mxu0 }
  0xd3   :  { %v659_v61 = vadd.f32 %v132_v60, %v46_v58 }
  0xd4   :  { %v134_v62 = vpop.f32.mrf.mxu0 }
  0xd5   :  { %v163_v63 = vmul.f32 0.044715, %v659_v61  ;;  %v135_v0 = vadd.f32 %v134_v62, %v50_v59  ;;  %v155_v57 = vmul.f32 0.5, %v659_v61 }
  0xd6   :  { %v138_v1 = vpop.f32.mrf.mxu0 }
  0xd7   :  { %v171_v2 = vmul.f32 %v163_v63, %v659_v61  ;;  %v663_v3 = vadd.f32 %v138_v1, %v46_v58  ;;  %v164_v4 = vmul.f32 0.044715, %v135_v0  ;;  %v156_v55 = vmul.f32 0.5, %v135_v0 }
  0xd8   :  { %v140_v5 = vpop.f32.mrf.mxu0 }
  0xd9   :  { %v165_v6 = vmul.f32 0.044715, %v663_v3  ;;  %v666_v7 = vadd.f32 %v140_v5, %v50_v59  ;;  %v172_v8 = vmul.f32 %v164_v4, %v135_v0  ;;  %v179_v9 = vmul.f32 %v171_v2, %v659_v61 }
  0xda   :  { %v144_v10 = vpop.f32.mrf.mxu0  ;;  %v157_v5 = vmul.f32 0.5, %v663_v3 }
  0xdb   :  { %v173_v11 = vmul.f32 %v165_v6, %v663_v3  ;;  %v166_v12 = vmul.f32 0.044715, %v666_v7  ;;  %v671_v13 = vadd.f32 %v144_v10, %v46_v58  ;;  %v180_v14 = vmul.f32 %v172_v8, %v135_v0 }
  0xdc   :  { %v146_v15 = vpop.f32.mrf.mxu0  ;;  %v187_v16 = vadd.f32 %v179_v9, %v659_v61  ;;  %v158_v1 = vmul.f32 0.5, %v666_v7 }
  0xdd   :  { %v174_v17 = vmul.f32 %v166_v12, %v666_v7  ;;  %v167_v18 = vmul.f32 0.044715, %v671_v13  ;;  %v147_v19 = vadd.f32 %v146_v15, %v50_v59  ;;  %v188_v20 = vadd.f32 %v180_v14, %v135_v0 }
  0xde   :  { %v150_v21 = vpop.f32.mrf.mxu0  ;;  %v195_v22 = vmul.f32 0.7978846, %v187_v16  ;;  %v181_v23 = vmul.f32 %v173_v11, %v663_v3  ;;  %v159_v14 = vmul.f32 0.5, %v671_v13 }
  0xdf   :  { %v175_v24 = vmul.f32 %v167_v18, %v671_v13  ;;  %v168_v25 = vmul.f32 0.044715, %v147_v19  ;;  %v678_v26 = vadd.f32 %v150_v21, %v46_v58  ;;  %v196_v27 = vmul.f32 0.7978846, %v188_v20 }
  0xe0   :  { %v152_v28 = vpop.f32.mrf.mxu0  ;;  %424 = vtanh.f32 %v195_v22  ;;  %v182_v29 = vmul.f32 %v174_v17, %v666_v7  ;;  %v189_v30 = vadd.f32 %v181_v23, %v663_v3  ;;  %v160_v0 = vmul.f32 0.5, %v147_v19  ;;  %v375_v22 = vld [vmem:[%s708_s4] ss:$0 sm:$0xff]  ;;  %s440_s4 = scalar_lea.vmem %s361_s19, 512 }
  0xe1   :  { %v176_v31 = vmul.f32 %v168_v25, %v147_v19  ;;  %v169_v32 = vmul.f32 0.044715, %v678_v26  ;;  %v153_v33 = vadd.f32 %v152_v28, %v50_v59  ;;  %426 = vtanh.f32 %v196_v27  ;;  %p441_p0 = scmp.ne.s32.totalorder %s361_s19, %s440_s4  ;;  %p446_p2 = scmp.lt.s32.totalorder %s440_s4, %s440_s4 }
  0xe2   :  { %v190_v34 = vadd.f32 %v182_v29, %v666_v7  ;;  %v197_v35 = vmul.f32 0.7978846, %v189_v30  ;;  %v183_v36 = vmul.f32 %v175_v24, %v671_v13  ;;  %v161_v20 = vmul.f32 0.5, %v678_v26 }
  0xe3   :  { %v177_v37 = vmul.f32 %v169_v32, %v678_v26  ;;  %v170_v38 = vmul.f32 0.044715, %v153_v33  ;;  %v184_v39 = vmul.f32 %v176_v31, %v147_v19  ;;  %v162_v7 = vmul.f32 0.5, %v153_v33  ;;  %p447_p3 = por %p446_p2, %p445_p1 }
  0xe4   :  { %v198_v40 = vmul.f32 0.7978846, %v190_v34  ;;  %428 = vtanh.f32 %v197_v35  ;;  %v191_v41 = vadd.f32 %v183_v36, %v671_v13 }
  0xe5   :  { %v178_v42 = vmul.f32 %v170_v38, %v153_v33  ;;  %v192_v43 = vadd.f32 %v184_v39, %v147_v19  ;;  %v185_v44 = vmul.f32 %v177_v37, %v678_v26  ;;  %p448_p4 = pnand %p447_p3, %p441_p0 }
  0xe6   :  { %430 = vtanh.f32 %v198_v40  ;;  %v199_v45 = vmul.f32 0.7978846, %v191_v41 }
  0xe7   :  { %v200_v46 = vmul.f32 0.7978846, %v192_v43  ;;  %v186_v47 = vmul.f32 %v178_v42, %v153_v33  ;;  %v193_v48 = vadd.f32 %v185_v44, %v678_v26 }
  0xe8   :  { %432 = vtanh.f32 %v199_v45 }
  0xe9   :  { %434 = vtanh.f32 %v200_v46  ;;  %v194_v49 = vadd.f32 %v186_v47, %v153_v33  ;;  %v201_v50 = vmul.f32 0.7978846, %v193_v48 }
  0xeb   :  { %v202_v51 = vmul.f32 0.7978846, %v194_v49  ;;  %436 = vtanh.f32 %v201_v50 }
  0xed   :  { %v425_v52 = vpop.eup %424  ;;  %438 = vtanh.f32 %v202_v51 }
  0xee   :  { %v427_v53 = vpop.eup %426  ;;  %v211_v54 = vadd.f32 1.0, %v425_v52 }
  0xef   :  { %v212_v56 = vadd.f32 1.0, %v427_v53 }
  0xf0   :  { %v219_v60 = vmul.f32 %v211_v54, %v155_v57 }
  0xf1   :  { %v429_v58 = vpop.eup %428  ;;  %v220_v59 = vmul.f32 %v212_v56, %v156_v55 }
  0xf2   :  { %v213_v63 = vadd.f32 1.0, %v429_v58 }
  0xf3   :  { %v431_v62 = vpop.eup %430  ;;  %330 = vmatprep.mubr.f32.mxu1 %v220_v59 }
  0xf4   :  { %331 = vmatmul.mubr.f32.vlgmr.msra.gmra.mxu1 %v219_v60  ;;  %v214_v2 = vadd.f32 1.0, %v431_v62  ;;  %v221_v9 = vmul.f32 %v213_v63, %v157_v5 }
  0xf5   :  { %v433_v4 = vpop.eup %432 }
  0xf6   :  { %v435_v6 = vpop.eup %434  ;;  %v222_v8 = vmul.f32 %v214_v2, %v158_v1  ;;  %v215_v11 = vadd.f32 1.0, %v433_v4 }
  0xf7   :  { %v216_v10 = vadd.f32 1.0, %v435_v6 }
  0xf8   :  { %v437_v61 = vpop.eup %436  ;;  %335 = vmatprep.mubr.f32.mxu1 %v222_v8  ;;  %v223_v16 = vmul.f32 %v215_v11, %v159_v14 }
  0xf9   :  { %336 = vmatmul.mubr.f32.gmra.mxu1 %v221_v9  ;;  %v224_v12 = vmul.f32 %v216_v10, %v160_v0  ;;  %v217_v18 = vadd.f32 1.0, %v437_v61 }
  0xfa   :  { %v439_v15 = vpop.eup %438 }
  0xfb   :  { %340 = vmatprep.mubr.f32.mxu1 %v224_v12  ;;  %v218_v17 = vadd.f32 1.0, %v439_v15  ;;  %v225_v19 = vmul.f32 %v217_v18, %v161_v20 }
  0xfd   :  { %341 = vmatmul.mubr.f32.gmra.mxu1 %v223_v16  ;;  %v226_v3 = vmul.f32 %v218_v17, %v162_v7 }
  0xff   :  { %345 = vmatprep.mubr.f32.mxu1 %v226_v3 }
 0x101   :  { %346 = vmatmul.mubr.f32.gmra.mxu1 %v225_v19 }
 0x1b4   :  { %v408_v21 = vpop.f32.mrf.mxu1 }
 0x1b6   :  { %v409_v23 = vpop.f32.mrf.mxu1 }
 0x1b7   :  { %v410_v13 = vadd.f32 %v409_v23, %v408_v21 }
 0x1b9   :  { %v333_v24 = vadd.f32 %v410_v13, %v375_v22  ;;  %v411_v25 = vpop.f32.mrf.mxu1 }
 0x1bb   :  { %351 = vst.msk [vmem:[#allocation2] sm:$0xff] %vm53_vm0, %v333_v24  ;;  %v412_v27 = vpop.f32.mrf.mxu1 }
 0x1bc   :  { %v413_v28 = vadd.f32 %v412_v27, %v411_v25 }
 0x1bd   :  { %v414_v29 = vpop.f32.mrf.mxu1 }
 0x1be   :  { %v338_v30 = vadd.f32 %v413_v28, %v375_v22 }
 0x1bf   :  { %v415_v31 = vpop.f32.mrf.mxu1 }
 0x1c0   :  { %352 = vst.msk [vmem:[#allocation2 + $0x8] sm:$0xff] %vm53_vm0, %v338_v30  ;;  %v416_v26 = vadd.f32 %v415_v31, %v414_v29 }
 0x1c1   :  { %v417_v32 = vpop.f32.mrf.mxu1 }
 0x1c2   :  { %v343_v33 = vadd.f32 %v416_v26, %v375_v22 }
 0x1c3   :  { %v418_v34 = vpop.f32.mrf.mxu1 }
 0x1c4   :  { %353 = vst.msk [vmem:[#allocation2 + $0x10] sm:$0xff] %vm53_vm0, %v343_v33  ;;  %v419_v35 = vadd.f32 %v418_v34, %v417_v32 }
 0x1c6   :  { %v348_v36 = vadd.f32 %v419_v35, %v375_v22 }
 0x1c8   :  { %354 = vst.msk [vmem:[#allocation2 + $0x18] sm:$0xff] %vm53_vm0, %v348_v36 }
 0x1c9   :  { %451 = shalt.err (!%p448_p4)
}
 0x1ca   :  { %s464_s20 = smov 128   ;;  %s465_s21 = smov 8  }
 0x1cb   :  { %366 = dma.vmem_to_hbm [thread:$0]  %s361_s19, 512, %s709_s5, [#allocation3], %s464_s20, %s464_s20, %s465_s21  }
 0x1cc   :  { %460 = dma.done.wait [#allocation3], 512  }
 0x1cd   :  { %461 = vsyncadd [#allocation3], 4294966784 }
 0x1ce   :  { %370 = vsyncpa [#allocation3], 1 }

</bundles_post_ra>
